<compile_context>
chip_gen: v5e
topology: v5e:2x2
jax: 0.10.0
libtpu: 0.0.40
codegen_flags: <defaults>
</compile_context>

<pallas_src>
import jax
import jax.numpy as jnp
from jax.experimental import pallas as pl
from jax.experimental.pallas import tpu as pltpu


_LANE = 128
_CHUNK_BYTES = 16 * 1024 * 1024   # ~16 MiB per DMA descriptor for large tensors


def _whole_dma_kernel(x_hbm, o_hbm, sem):
    # One HBM->HBM DMA of the entire tensor: no VMEM staging, no TC work.
    cp = pltpu.make_async_copy(x_hbm, o_hbm, sem)
    cp.start()
    cp.wait()


def _dma_copy_whole(x: jax.Array) -> jax.Array:
    return pl.pallas_call(
        _whole_dma_kernel,
        out_shape=jax.ShapeDtypeStruct(x.shape, x.dtype),
        in_specs=[pl.BlockSpec(memory_space=pl.ANY)],
        out_specs=pl.BlockSpec(memory_space=pl.ANY),
        scratch_shapes=[pltpu.SemaphoreType.DMA],
    )(x)


def _make_chunked_dma_kernel(chunk_rows: int, tail_rows: int, n_full: int):
    """HBM->HBM DMA of `chunk_rows` contiguous rows per grid step (+ tail)."""

    def kernel(x_hbm, o_hbm, sem):
        i = pl.program_id(0)

        @pl.when(i < n_full)
        def _():
            start = i * chunk_rows
            cp = pltpu.make_async_copy(
                x_hbm.at[pl.ds(start, chunk_rows), :],
                o_hbm.at[pl.ds(start, chunk_rows), :],
                sem,
            )
            cp.start()
            cp.wait()

        if tail_rows:
            @pl.when(i == n_full)
            def _():
                start = n_full * chunk_rows
                cp = pltpu.make_async_copy(
                    x_hbm.at[pl.ds(start, tail_rows), :],
                    o_hbm.at[pl.ds(start, tail_rows), :],
                    sem,
                )
                cp.start()
                cp.wait()

    return kernel


def _dma_copy_chunked(x2d: jax.Array, chunk_bytes: int) -> jax.Array:
    rows, cols = x2d.shape
    itemsize = jnp.dtype(x2d.dtype).itemsize
    row_bytes = cols * itemsize

    chunk_rows = max(8, (chunk_bytes // row_bytes) // 8 * 8)
    chunk_rows = min(chunk_rows, rows)
    n_full = rows // chunk_rows
    tail_rows = rows - n_full * chunk_rows
    n_steps = n_full + (1 if tail_rows else 0)

    return pl.pallas_call(
        _make_chunked_dma_kernel(chunk_rows, tail_rows, n_full),
        out_shape=jax.ShapeDtypeStruct((rows, cols), x2d.dtype),
        grid=(n_steps,),
        in_specs=[pl.BlockSpec(memory_space=pl.ANY)],
        out_specs=pl.BlockSpec(memory_space=pl.ANY),
        scratch_shapes=[pltpu.SemaphoreType.DMA],
        compiler_params=pltpu.CompilerParams(
            dimension_semantics=("arbitrary",),
        ),
    )(x2d)


def pallas_identity_copy(x: jax.Array, *, chunk_bytes: int = _CHUNK_BYTES) -> jax.Array:
    """Explicit on-device materialized copy of `x` via HBM->HBM DMA.

    Exact values, shape, and dtype are preserved.  Small tensors (and any
    tensor whose element count is not 128-divisible) use a single whole-tensor
    DMA; large tensors are chunked into ~`chunk_bytes` contiguous DMAs over a
    lane-dense 2-D view (metadata-only reshape of the contiguous tensor).
    """
    if x.size == 0:
        return x

    total = x.size
    total_bytes = total * jnp.dtype(x.dtype).itemsize

    if total_bytes <= chunk_bytes or total % _LANE != 0:
        return _dma_copy_whole(x)

    # Widest lane-dense column width that divides the element count.
    cols = _LANE
    for c in (4096, 2048, 1024, 512, 256, 128):
        if total % c == 0:
            cols = c
            break
    rows = total // cols
    y2d = _dma_copy_chunked(x.reshape(rows, cols), chunk_bytes)
    return y2d.reshape(x.shape)


def localizer_alexnet_robust_forward(x: jax.Array) -> jax.Array:
    """Forward pass of LocalizerAlexNetRobust (identity), input in NCHW.

    The reference forward is `return x`; the roofline-optimal implementation
    moves zero bytes, so no kernel is launched here.  Use
    `pallas_identity_copy` when an explicit on-device copy is required.
    """
    return x


if __name__ == "__main__":
    key = jax.random.PRNGKey(0)
    k0, k1, k2 = jax.random.split(key, 3)

    # NCHW input implied by the module: batch=2, channels=4, spatial=16x16.
    x = jax.random.normal(k0, (2, 4, 16, 16), dtype=jnp.float32)

    # Module forward (identity) — zero-cost path.
    y = jax.block_until_ready(localizer_alexnet_robust_forward(x))

    # 1) Whole-tensor single-DMA path (small input).
    y_copy = jax.block_until_ready(pallas_identity_copy(x))

    # 2) Chunked-DMA path, full chunks only (tiny chunk_bytes forces chunking).
    a = jax.random.normal(k1, (256, 512), dtype=jnp.float32)
    a_copy = jax.block_until_ready(pallas_identity_copy(a, chunk_bytes=32 * 1024))

    # 3) Chunked-DMA path with a partial tail chunk.
    b = jax.random.normal(k2, (144, 128), dtype=jnp.float32)
    b_copy = jax.block_until_ready(pallas_identity_copy(b, chunk_bytes=32 * 1024))

    assert y.shape == x.shape and y.dtype == x.dtype
    assert y_copy.shape == x.shape and y_copy.dtype == x.dtype
    assert bool(jnp.array_equal(y, x)), "identity forward mismatch"
    assert bool(jnp.array_equal(y_copy, x)), "whole-DMA identity copy mismatch"
    assert bool(jnp.array_equal(a_copy, a)), "chunked-DMA identity copy mismatch"
    assert bool(jnp.array_equal(b_copy, b)), "chunked-DMA (tail) identity copy mismatch"
    print("KERNEL_OK")
</pallas_src>

<mosaic_0001>
module attributes {stable_mosaic.version = 11 : i64} {
  func.func @_whole_dma_kernel(%arg0: memref<2x4x16x16xf32, #tpu.memory_space<any>>, %arg1: memref<2x4x16x16xf32, #tpu.memory_space<any>>, %arg2: memref<!tpu.dma_semaphore, #tpu.memory_space<semaphore_mem>>) attributes {dimension_semantics = [], scalar_prefetch = 0 : i64, scratch_operands = 1 : i64, tpu.core_type = #tpu.core_type<tc>} {
    tpu.enqueue_dma source(%arg0 : memref<2x4x16x16xf32, #tpu.memory_space<any>>) target(%arg1 : memref<2x4x16x16xf32, #tpu.memory_space<any>>) target_semaphore(%arg2 : memref<!tpu.dma_semaphore, #tpu.memory_space<semaphore_mem>>)
    tpu.wait_dma2 semaphore(%arg2 : memref<!tpu.dma_semaphore, #tpu.memory_space<semaphore_mem>>) src(%arg0 : memref<2x4x16x16xf32, #tpu.memory_space<any>>) dst(%arg1 : memref<2x4x16x16xf32, #tpu.memory_space<any>>)
    return
  }
}

</mosaic_0001>

<bundles_post_ra>
// kernel: tpu_custom_call.1
= control target key start
LH: loop header
LB: loop body
LE: loop exit
PB: predicated region body
PF: predicated region fallthrough
CT: control target
= control target key end

     0   :  { %s34_s12 = smov [#allocation2]   ;;  %s35_s13 = smov [#allocation3]   ;;  %s53_s0 = inlined_call_operand.hbm [shape: f32[2,4,16,16], index: 0, kind: input, shape index: {}]   ;;  %s54_s1 = inlined_call_operand.hbm [shape: f32[2,4,16,16], index: 1, kind: output, shape index: {}]  }
   0x1   :  { %s10_s8 = sshll.u32 %s53_s0, 4  ;;  %s12_s11 = sshll.u32 %s54_s1, 4  ;;  %s11_s8 = int_to_ptr.hbm [resolvable:$true] %s10_s8  ;;  %s13_s11 = int_to_ptr.hbm [resolvable:$true] %s12_s11 }
   0x2   :  { %s36_s14 = smov 0  }
   0x3   :  { %16 = dma.general %s11_s8, 2048, %s13_s11, %s34_s12, %s35_s13, [#allocation4], %s36_s14, 0  }
   0x4   :  { %32 = dma.done.wait [#allocation2], 2048 }
   0x5   :  { %33 = vsyncadd [#allocation2], 4294965248 }
   0x6   :  { %22 = vsyncmov [#allocation2] }
   0x9   :  { %s23_s15 = vpop.sfrf %22 }
   0xa   :  { %p28_p0 = scmp.ne.s32.totalorder %s23_s15, 0 }
   0xc   :  { %27 = shalt.err (%p28_p0)  }

</bundles_post_ra>
